<compile_context>
chip_gen: v5e
topology: v5e:2x2
jax: 0.10.0
libtpu: 0.0.40
codegen_flags: <defaults>
</compile_context>

<pallas_src>
import jax
import jax.numpy as jnp
import numpy as np
from jax import lax
from jax.experimental import pallas as pl
from jax.experimental.pallas import tpu as pltpu


def decoder_recurrence_kernel(enc_ref, att1_ref, h0_ref, c0_ref, embg_ref,
                              wdec_ref, bdec_ref, wfull_ref, bfull_ref,
                              wctx_ref, whh_ref,
                              hhist_ref, alpha_ref):
    B, H = h0_ref.shape
    T = embg_ref.shape[0]

    # Resident (loaded once) operands.
    enc = enc_ref[...]          # (B, P, E)
    att1 = att1_ref[...]        # (B, P, A)  -- precomputed encoder projection
    wdec = wdec_ref[...]        # (H, A)
    bdec = bdec_ref[...]        # (1, A)
    wfull = wfull_ref[...]      # (1, A)
    bfull = bfull_ref[...]      # (1, 1)
    wctx = wctx_ref[...]        # (E, 4H)
    whh = whh_ref[...]          # (H, 4H)

    def step(t, carry):
        h, c = carry                                                     # (B, H) each

        # ---- Attention ----
        att2 = jnp.dot(h, wdec, preferred_element_type=jnp.float32) + bdec     # (B, A)
        pre = jnp.maximum(att1 + att2[:, None, :], 0.0)                        # (B, P, A)
        att = jnp.sum(pre * wfull, axis=2) + bfull                             # (B, P)
        m = jnp.max(att, axis=1, keepdims=True)
        e = jnp.exp(att - m)
        alpha = e / jnp.sum(e, axis=1, keepdims=True)                          # softmax over P

        # context = sum_p alpha[b,p] * enc[b,p,:] as a batched MXU matvec
        # (avoids materializing a (B, P, E) temporary on the VPU).
        ctx = jnp.einsum('bqp,bpe->bqe', alpha[:, None, :], enc,
                         preferred_element_type=jnp.float32)[:, 0, :]          # (B, E)

        # ---- LSTMCell (i, f, g, o).  Embedding term + both biases were
        # precomputed for all steps outside the kernel (embg_ref[t]). ----
        gates = (jnp.dot(ctx, wctx, preferred_element_type=jnp.float32)
                 + jnp.dot(h, whh, preferred_element_type=jnp.float32)
                 + embg_ref[t])                                                # (B, 4H)
        i_g = jax.nn.sigmoid(gates[:, 0:H])
        f_g = jax.nn.sigmoid(gates[:, H:2 * H])
        g_g = jnp.tanh(gates[:, 2 * H:3 * H])
        o_g = jax.nn.sigmoid(gates[:, 3 * H:4 * H])
        c_new = f_g * c + i_g * g_g
        h_new = o_g * jnp.tanh(c_new)

        hhist_ref[t] = h_new
        alpha_ref[t] = alpha
        return (h_new, c_new)

    lax.fori_loop(0, T, step, (h0_ref[...], c0_ref[...]))


def decoder_rnn_forward(params, encoder_out, captions):
    """Pallas implementation of DecoderRNN.forward (caption_lengths unused there)."""
    encoder_out = encoder_out.astype(jnp.float32)
    B, P, E = encoder_out.shape
    T = captions.shape[1] - 1
    Dm = params['embedding'].shape[1]
    H = params['w_init_h'].shape[0]
    V = params['w_fc'].shape[0]

    # ---- Hoisted, time-invariant work: large well-shaped XLA matmuls ----
    emb_seq = jnp.transpose(params['embedding'][captions[:, :T]], (1, 0, 2))   # (T, B, Dm)
    emb_gates = (emb_seq.reshape(T * B, Dm) @ params['w_ih'][:, :Dm].T
                 + params['b_ih'] + params['b_hh']).reshape(T, B, 4 * H)       # (T, B, 4H)
    att1 = jnp.einsum('bpe,ae->bpa', encoder_out, params['w_enc']) \
        + params['b_enc']                                                      # (B, P, A)
    mean_enc = encoder_out.mean(axis=1)
    h0 = mean_enc @ params['w_init_h'].T + params['b_init_h']                  # (B, H)
    c0 = mean_enc @ params['w_init_c'].T + params['b_init_c']                  # (B, H)

    args = (
        encoder_out,                              # (B, P, E)
        att1.astype(jnp.float32),                 # (B, P, A)
        h0.astype(jnp.float32),                   # (B, H)
        c0.astype(jnp.float32),                   # (B, H)
        emb_gates.astype(jnp.float32),            # (T, B, 4H)
        params['w_dec'].T,                        # (H, A)
        params['b_dec'][None, :],                 # (1, A)
        params['w_full'],                         # (1, A)
        params['b_full'].reshape(1, 1),           # (1, 1)
        params['w_ih'][:, Dm:].T,                 # (E, 4H)  context part of W_ih
        params['w_hh'].T,                         # (H, 4H)
    )

    # No grid: single invocation, everything single-buffered in VMEM.
    in_specs = [pl.BlockSpec(a.shape, lambda n=a.ndim: (0,) * n) for a in args]
    out_specs = [
        pl.BlockSpec((T, B, H), lambda: (0, 0, 0)),
        pl.BlockSpec((T, B, P), lambda: (0, 0, 0)),
    ]

    h_hist, alphas_tbp = pl.pallas_call(
        decoder_recurrence_kernel,
        in_specs=in_specs,
        out_specs=out_specs,
        out_shape=(
            jax.ShapeDtypeStruct((T, B, H), jnp.float32),
            jax.ShapeDtypeStruct((T, B, P), jnp.float32),
        ),
        compiler_params=pltpu.CompilerParams(vmem_limit_bytes=64 * 1024 * 1024),
    )(*args)

    # Hoisted fc: transpose the *small* (T, B, H) history (not (T, B, V)),
    # then one (B*T, H) x (H, V) MXU-efficient matmul directly in batch-major.
    # TODO(synk): nn.Dropout(0.5) before fc is identity in eval mode; training-mode
    # dropout omitted.
    h_bt = jnp.transpose(h_hist, (1, 0, 2))                                    # (B, T, H)
    predictions = (h_bt.reshape(B * T, H) @ params['w_fc'].T
                   + params['b_fc']).reshape(B, T, V)                          # (B, T, V)
    alphas = jnp.transpose(alphas_tbp, (1, 0, 2))                              # (B, T, P)
    return predictions, alphas


def reference_forward(params, encoder_out, captions):
    """Pure-JAX reference mirroring the PyTorch module (eval-mode dropout)."""
    encoder_out = encoder_out.astype(jnp.float32)
    T = captions.shape[1] - 1
    emb = params['embedding'][captions]
    mean_enc = encoder_out.mean(axis=1)
    h = mean_enc @ params['w_init_h'].T + params['b_init_h']
    c = mean_enc @ params['w_init_c'].T + params['b_init_c']
    H = h.shape[1]
    preds_list, alphas_list = [], []
    for t in range(T):
        att1 = encoder_out @ params['w_enc'].T + params['b_enc']
        att2 = h @ params['w_dec'].T + params['b_dec']
        pre = jax.nn.relu(att1 + att2[:, None, :])
        att = (pre @ params['w_full'].T)[..., 0] + params['b_full'][0]
        alpha = jax.nn.softmax(att, axis=1)
        context = (encoder_out * alpha[:, :, None]).sum(axis=1)
        x = jnp.concatenate([emb[:, t, :], context], axis=1)
        gates = (x @ params['w_ih'].T + params['b_ih']
                 + h @ params['w_hh'].T + params['b_hh'])
        i_g = jax.nn.sigmoid(gates[:, :H])
        f_g = jax.nn.sigmoid(gates[:, H:2 * H])
        g_g = jnp.tanh(gates[:, 2 * H:3 * H])
        o_g = jax.nn.sigmoid(gates[:, 3 * H:])
        c = f_g * c + i_g * g_g
        h = o_g * jnp.tanh(c)
        preds_list.append(h @ params['w_fc'].T + params['b_fc'])
        alphas_list.append(alpha)
    return jnp.stack(preds_list, axis=1), jnp.stack(alphas_list, axis=1)


def init_params(key, attention_dim, embed_dim, decoder_dim, vocab_size, encoder_dim):
    A, Dm, H, V, E = attention_dim, embed_dim, decoder_dim, vocab_size, encoder_dim
    keys = jax.random.split(key, 16)
    u = lambda k, shape: jax.random.uniform(k, shape, jnp.float32, -0.1, 0.1)
    return dict(
        w_enc=u(keys[0], (A, E)),   b_enc=u(keys[1], (A,)),
        w_dec=u(keys[2], (A, H)),   b_dec=u(keys[3], (A,)),
        w_full=u(keys[4], (1, A)),  b_full=u(keys[5], (1,)),
        embedding=u(keys[6], (V, Dm)),
        w_ih=u(keys[7], (4 * H, Dm + E)), b_ih=u(keys[8], (4 * H,)),
        w_hh=u(keys[9], (4 * H, H)),      b_hh=u(keys[10], (4 * H,)),
        w_init_h=u(keys[11], (H, E)),     b_init_h=u(keys[12], (H,)),
        w_init_c=u(keys[13], (H, E)),     b_init_c=u(keys[14], (H,)),
        w_fc=u(keys[15], (V, H)),         b_fc=jnp.zeros((V,), jnp.float32),
    )


if __name__ == "__main__":
    # Small, deterministic shapes consistent with the module's forward.
    B, P = 2, 16                # batch, num_pixels (e.g. 4x4 encoder grid, flattened)
    encoder_dim = 32
    attention_dim = 32
    embed_dim = 16
    decoder_dim = 32
    vocab_size = 64
    max_len = 8                 # captions length -> T = 7 decode steps

    key = jax.random.PRNGKey(0)
    k_enc, k_cap, k_par = jax.random.split(key, 3)

    params = init_params(k_par, attention_dim, embed_dim, decoder_dim,
                         vocab_size, encoder_dim)
    encoder_out = jax.random.normal(k_enc, (B, P, encoder_dim), jnp.float32)
    captions = jax.random.randint(k_cap, (B, max_len), 0, vocab_size, jnp.int32)
    caption_lengths = jnp.full((B,), max_len, jnp.int32)  # unused by forward (as in PyTorch)

    predictions, alphas = decoder_rnn_forward(params, encoder_out, captions)
    jax.block_until_ready((predictions, alphas))

    ref_preds, ref_alphas = reference_forward(params, encoder_out, captions)
    np.testing.assert_allclose(np.asarray(predictions), np.asarray(ref_preds),
                               rtol=1e-4, atol=1e-4)
    np.testing.assert_allclose(np.asarray(alphas), np.asarray(ref_alphas),
                               rtol=1e-4, atol=1e-4)
    assert predictions.shape == (B, max_len - 1, vocab_size)
    assert alphas.shape == (B, max_len - 1, P)

    print("KERNEL_OK")
</pallas_src>

<mosaic_0001>
module attributes {stable_mosaic.version = 11 : i64} {
  func.func @decoder_recurrence_kernel(%arg0: memref<2x16x32xf32, #tpu.memory_space<vmem>>, %arg1: memref<2x16x32xf32, #tpu.memory_space<vmem>>, %arg2: memref<2x32xf32, #tpu.memory_space<vmem>>, %arg3: memref<2x32xf32, #tpu.memory_space<vmem>>, %arg4: memref<7x2x128xf32, #tpu.memory_space<vmem>>, %arg5: memref<32x32xf32, #tpu.memory_space<vmem>>, %arg6: memref<1x32xf32, #tpu.memory_space<vmem>>, %arg7: memref<1x32xf32, #tpu.memory_space<vmem>>, %arg8: memref<1x1xf32, #tpu.memory_space<vmem>>, %arg9: memref<32x128xf32, #tpu.memory_space<vmem>>, %arg10: memref<32x128xf32, #tpu.memory_space<vmem>>, %arg11: memref<7x2x32xf32, #tpu.memory_space<vmem>>, %arg12: memref<7x2x16xf32, #tpu.memory_space<vmem>>) attributes {dimension_semantics = [], scalar_prefetch = 0 : i64, scratch_operands = 0 : i64, tpu.core_type = #tpu.core_type<tc>} {
    %c0 = arith.constant 0 : index
    %c0_0 = arith.constant 0 : index
    %c0_1 = arith.constant 0 : index
    %0 = vector.load %arg0[%c0, %c0_0, %c0_1] : memref<2x16x32xf32, #tpu.memory_space<vmem>>, vector<2x16x32xf32>
    %c0_2 = arith.constant 0 : index
    %c0_3 = arith.constant 0 : index
    %c0_4 = arith.constant 0 : index
    %1 = vector.load %arg1[%c0_2, %c0_3, %c0_4] : memref<2x16x32xf32, #tpu.memory_space<vmem>>, vector<2x16x32xf32>
    %c0_5 = arith.constant 0 : index
    %c0_6 = arith.constant 0 : index
    %2 = vector.load %arg5[%c0_5, %c0_6] : memref<32x32xf32, #tpu.memory_space<vmem>>, vector<32x32xf32>
    %c0_7 = arith.constant 0 : index
    %c0_8 = arith.constant 0 : index
    %3 = vector.load %arg6[%c0_7, %c0_8] : memref<1x32xf32, #tpu.memory_space<vmem>>, vector<1x32xf32>
    %c0_9 = arith.constant 0 : index
    %c0_10 = arith.constant 0 : index
    %4 = vector.load %arg7[%c0_9, %c0_10] : memref<1x32xf32, #tpu.memory_space<vmem>>, vector<1x32xf32>
    %c0_11 = arith.constant 0 : index
    %c0_12 = arith.constant 0 : index
    %5 = vector.load %arg8[%c0_11, %c0_12] : memref<1x1xf32, #tpu.memory_space<vmem>>, vector<1x1xf32>
    %c0_13 = arith.constant 0 : index
    %c0_14 = arith.constant 0 : index
    %6 = vector.load %arg9[%c0_13, %c0_14] : memref<32x128xf32, #tpu.memory_space<vmem>>, vector<32x128xf32>
    %c0_15 = arith.constant 0 : index
    %c0_16 = arith.constant 0 : index
    %7 = vector.load %arg10[%c0_15, %c0_16] : memref<32x128xf32, #tpu.memory_space<vmem>>, vector<32x128xf32>
    %c0_17 = arith.constant 0 : index
    %c0_18 = arith.constant 0 : index
    %8 = vector.load %arg2[%c0_17, %c0_18] : memref<2x32xf32, #tpu.memory_space<vmem>>, vector<2x32xf32>
    %c0_19 = arith.constant 0 : index
    %c0_20 = arith.constant 0 : index
    %9 = vector.load %arg3[%c0_19, %c0_20] : memref<2x32xf32, #tpu.memory_space<vmem>>, vector<2x32xf32>
    %c0_i32 = arith.constant 0 : i32
    %c7_i32 = arith.constant 7 : i32
    %10 = arith.addi %c0_i32, %c7_i32 : i32
    %c1_i32 = arith.constant 1 : i32
    %11:2 = scf.for %arg13 = %c0_i32 to %10 step %c1_i32 iter_args(%arg14 = %8, %arg15 = %9) -> (vector<2x32xf32>, vector<2x32xf32>)  : i32 {
      %cst = arith.constant dense<0.000000e+00> : vector<2x32xf32>
      %12 = tpu.matmul %arg14, %2, %cst {dimension_numbers = #tpu.dot_dimension_numbers<[1], [0], [0], [1], [0, 0, 1, 1], [], []>} : vector<2x32xf32>, vector<32x32xf32>, vector<2x32xf32> -> vector<2x32xf32>
      %13 = vector.broadcast %3 : vector<1x32xf32> to vector<2x32xf32>
      %14 = arith.addf %12, %13 : vector<2x32xf32>
      %15 = vector.shape_cast %14 : vector<2x32xf32> to vector<2x1x32xf32>
      %16 = vector.broadcast %15 : vector<2x1x32xf32> to vector<2x16x32xf32>
      %17 = arith.addf %1, %16 : vector<2x16x32xf32>
      %cst_22 = arith.constant 0.000000e+00 : f32
      %18 = vector.broadcast %cst_22 : f32 to vector<2x16x32xf32>
      %19 = arith.maximumf %17, %18 : vector<2x16x32xf32>
      %20 = vector.shape_cast %4 : vector<1x32xf32> to vector<1x1x32xf32>
      %21 = vector.broadcast %20 : vector<1x1x32xf32> to vector<2x16x32xf32>
      %22 = arith.mulf %19, %21 : vector<2x16x32xf32>
      %cst_23 = arith.constant dense<0.000000e+00> : vector<2x16xf32>
      %23 = vector.multi_reduction <add>, %22, %cst_23 [2] : vector<2x16x32xf32> to vector<2x16xf32>
      %24 = vector.broadcast %5 : vector<1x1xf32> to vector<2x16xf32>
      %25 = arith.addf %23, %24 : vector<2x16xf32>
      %cst_24 = arith.constant dense<0xFF800000> : vector<2xf32>
      %26 = vector.multi_reduction <maximumf>, %25, %cst_24 [1] : vector<2x16xf32> to vector<2xf32>
      %27 = vector.shape_cast %26 : vector<2xf32> to vector<2x1xf32>
      %28 = vector.broadcast %27 : vector<2x1xf32> to vector<2x16xf32>
      %29 = arith.subf %25, %28 : vector<2x16xf32>
      %30 = math.exp %29 : vector<2x16xf32>
      %cst_25 = arith.constant dense<0.000000e+00> : vector<2xf32>
      %31 = vector.multi_reduction <add>, %30, %cst_25 [1] : vector<2x16xf32> to vector<2xf32>
      %32 = vector.shape_cast %31 : vector<2xf32> to vector<2x1xf32>
      %33 = vector.broadcast %32 : vector<2x1xf32> to vector<2x16xf32>
      %34 = arith.divf %30, %33 : vector<2x16xf32>
      %35 = vector.shape_cast %34 : vector<2x16xf32> to vector<2x1x16xf32>
      "tpu.trace_start"() <{level = 10 : i32, message = "bqp,bpe->bqe"}> : () -> ()
      %cst_26 = arith.constant dense<0.000000e+00> : vector<2x1x32xf32>
      %36 = tpu.matmul %35, %0, %cst_26 {dimension_numbers = #tpu.dot_dimension_numbers<[2], [1], [1], [2], [0, 0, 0, 1, 1, 2], [0], [0]>} : vector<2x1x16xf32>, vector<2x16x32xf32>, vector<2x1x32xf32> -> vector<2x1x32xf32>
      "tpu.trace_stop"() : () -> ()
      %37 = vector.shape_cast %36 : vector<2x1x32xf32> to vector<2x32xf32>
      %cst_27 = arith.constant dense<0.000000e+00> : vector<2x128xf32>
      %38 = tpu.matmul %37, %6, %cst_27 {dimension_numbers = #tpu.dot_dimension_numbers<[1], [0], [0], [1], [0, 0, 1, 1], [], []>} : vector<2x32xf32>, vector<32x128xf32>, vector<2x128xf32> -> vector<2x128xf32>
      %cst_28 = arith.constant dense<0.000000e+00> : vector<2x128xf32>
      %39 = tpu.matmul %arg14, %7, %cst_28 {dimension_numbers = #tpu.dot_dimension_numbers<[1], [0], [0], [1], [0, 0, 1, 1], [], []>} : vector<2x32xf32>, vector<32x128xf32>, vector<2x128xf32> -> vector<2x128xf32>
      %40 = arith.addf %38, %39 : vector<2x128xf32>
      %41 = arith.index_cast %arg13 : i32 to index
      %c0_29 = arith.constant 0 : index
      %c0_30 = arith.constant 0 : index
      %42 = vector.load %arg4[%41, %c0_29, %c0_30] : memref<7x2x128xf32, #tpu.memory_space<vmem>>, vector<1x2x128xf32>
      %43 = vector.shape_cast %42 : vector<1x2x128xf32> to vector<2x128xf32>
      %44 = arith.addf %40, %43 : vector<2x128xf32>
      %45 = vector.extract_strided_slice %44 {offsets = [0, 0], sizes = [2, 32], strides = [1, 1]} : vector<2x128xf32> to vector<2x32xf32>
      %46 = arith.negf %45 : vector<2x32xf32>
      %47 = math.exp %46 : vector<2x32xf32>
      %cst_31 = arith.constant 1.000000e+00 : f32
      %48 = vector.broadcast %cst_31 : f32 to vector<2x32xf32>
      %49 = arith.addf %48, %47 : vector<2x32xf32>
      %50 = arith.divf %48, %49 : vector<2x32xf32>
      %51 = vector.extract_strided_slice %44 {offsets = [0, 32], sizes = [2, 32], strides = [1, 1]} : vector<2x128xf32> to vector<2x32xf32>
      %52 = arith.negf %51 : vector<2x32xf32>
      %53 = math.exp %52 : vector<2x32xf32>
      %cst_32 = arith.constant 1.000000e+00 : f32
      %54 = vector.broadcast %cst_32 : f32 to vector<2x32xf32>
      %55 = arith.addf %54, %53 : vector<2x32xf32>
      %56 = arith.divf %54, %55 : vector<2x32xf32>
      %57 = vector.extract_strided_slice %44 {offsets = [0, 64], sizes = [2, 32], strides = [1, 1]} : vector<2x128xf32> to vector<2x32xf32>
      %58 = math.tanh %57 : vector<2x32xf32>
      %59 = vector.extract_strided_slice %44 {offsets = [0, 96], sizes = [2, 32], strides = [1, 1]} : vector<2x128xf32> to vector<2x32xf32>
      %60 = arith.negf %59 : vector<2x32xf32>
      %61 = math.exp %60 : vector<2x32xf32>
      %cst_33 = arith.constant 1.000000e+00 : f32
      %62 = vector.broadcast %cst_33 : f32 to vector<2x32xf32>
      %63 = arith.addf %62, %61 : vector<2x32xf32>
      %64 = arith.divf %62, %63 : vector<2x32xf32>
      %65 = arith.mulf %56, %arg15 : vector<2x32xf32>
      %66 = arith.mulf %50, %58 : vector<2x32xf32>
      %67 = arith.addf %65, %66 : vector<2x32xf32>
      %68 = math.tanh %67 : vector<2x32xf32>
      %69 = arith.mulf %64, %68 : vector<2x32xf32>
      %70 = arith.index_cast %arg13 : i32 to index
      %c0_34 = arith.constant 0 : index
      %c0_35 = arith.constant 0 : index
      %71 = vector.load %arg11[%70, %c0_34, %c0_35] : memref<7x2x32xf32, #tpu.memory_space<vmem>>, vector<1x2x32xf32>
      %72 = vector.shape_cast %71 : vector<1x2x32xf32> to vector<2x32xf32>
      %73 = vector.shape_cast %69 : vector<2x32xf32> to vector<1x2x32xf32>
      tpu.vector_store %arg11[%70, %c0_34, %c0_35], %73 {strides = array<i32>} : memref<7x2x32xf32, #tpu.memory_space<vmem>>, vector<1x2x32xf32>,
      %74 = arith.index_cast %arg13 : i32 to index
      %c0_36 = arith.constant 0 : index
      %c0_37 = arith.constant 0 : index
      %75 = vector.load %arg12[%74, %c0_36, %c0_37] : memref<7x2x16xf32, #tpu.memory_space<vmem>>, vector<1x2x16xf32>
      %76 = vector.shape_cast %75 : vector<1x2x16xf32> to vector<2x16xf32>
      %77 = vector.shape_cast %34 : vector<2x16xf32> to vector<1x2x16xf32>
      tpu.vector_store %arg12[%74, %c0_36, %c0_37], %77 {strides = array<i32>} : memref<7x2x16xf32, #tpu.memory_space<vmem>>, vector<1x2x16xf32>,
      scf.yield %69, %67 : vector<2x32xf32>, vector<2x32xf32>
    }
    %c7_i32_21 = arith.constant 7 : i32
    return
  }
}

</mosaic_0001>

<bundles_post_ra>
// kernel: tpu_custom_call.1
= control target key start
LH: loop header
LB: loop body
LE: loop exit
PB: predicated region body
PF: predicated region fallthrough
CT: control target
= control target key end

     0   :  { %s1157_s0 = inlined_call_operand.hbm [shape: f32[2,16,32], index: 0, kind: input, shape index: {}]   ;;  %s1158_s1 = inlined_call_operand.hbm [shape: f32[2,16,32], index: 1, kind: input, shape index: {}]   ;;  %s1159_s2 = inlined_call_operand.vmem [shape: f32[2,32], index: 2, kind: input, shape index: {}]   ;;  %s1160_s3 = inlined_call_operand.vmem [shape: f32[2,32], index: 3, kind: input, shape index: {}]   ;;  %s1161_s4 = inlined_call_operand.hbm [shape: f32[7,2,128], index: 4, kind: input, shape index: {}]   ;;  %s1162_s5 = inlined_call_operand.hbm [shape: f32[32,32], index: 5, kind: input, shape index: {}]   ;;  %s1163_s6 = inlined_call_operand.vmem [shape: f32[1,32], index: 6, kind: input, shape index: {}]   ;;  %s1164_s7 = inlined_call_operand.vmem [shape: f32[1,32], index: 7, kind: input, shape index: {}]   ;;  %s1165_s8 = inlined_call_operand.<no memory space> [shape: f32[1,1], index: 8, kind: input, shape index: {}]   ;;  %s1166_s9 = inlined_call_operand.hbm [shape: f32[32,128], index: 9, kind: input, shape index: {}]   ;;  %s1167_s10 = inlined_call_operand.hbm [shape: f32[32,128], index: 10, kind: input, shape index: {}]   ;;  %s1168_s11 = inlined_call_operand.hbm [shape: f32[7,2,32], index: 11, kind: output, shape index: {0}]   ;;  %s1169_s12 = inlined_call_operand.hbm [shape: f32[7,2,16], index: 12, kind: output, shape index: {1}]  }
   0x1   :  { %v18_v0 = vstv %s1165_s8 }
   0x2   :  { %19 = vst [vmem:[#allocation2] sm:$0x1] %v18_v0 }
   0x3   :  { %20 = vsyncpa [#allocation4], 0 }
   0x4   :  { %21 = vsyncpa [#allocation7], 0 }
   0x5   :  { %22 = vsyncpa [#allocation10], 0 }
   0x6   :  { %23 = vsyncpa [#allocation13], 0 }
   0x7   :  { %24 = vsyncpa [#allocation5], 0 }
   0x8   :  { %25 = vsyncpa [#allocation16], 0  ;;  %s43_s25 = sshll.u32 %s1158_s1, 4  ;;  %s871_s26 = smov [#allocation6]   ;;  %s44_s25 = int_to_ptr.hbm [resolvable:$true] %s43_s25 }
   0x9   :  { %s45_s27 = sshll.u32 %s871_s26, 4  ;;  %s73_s30 = sshll.u32 %s1162_s5, 4  ;;  %s46_s27 = int_to_ptr.vmem [resolvable:$true] %s45_s27  ;;  %s74_s30 = int_to_ptr.hbm [resolvable:$true] %s73_s30 }
   0xa   :  { %s872_s8 = smov 128   ;;  %s873_s13 = smov 8  }
   0xb   :  { %51 = dma.hbm_to_vmem [thread:$0]  %s44_s25, 512, %s46_s27, [#allocation7], %s872_s8, %s872_s8, %s873_s13  }
   0xc   :  { %s874_s14 = smov [#allocation9]   ;;  %s30_s1 = sshll.u32 %s1157_s0, 4  ;;  %s31_s1 = int_to_ptr.hbm [resolvable:$true] %s30_s1 }
   0xd   :  { %s75_s15 = sshll.u32 %s874_s14, 4  ;;  %s60_s19 = sshll.u32 %s1161_s4, 4  ;;  %s76_s15 = int_to_ptr.vmem [resolvable:$true] %s75_s15  ;;  %s61_s19 = int_to_ptr.hbm [resolvable:$true] %s60_s19 }
   0xe   :  { %81 = dma.hbm_to_vmem [thread:$0]  %s74_s30, 512, %s76_s15, [#allocation10], %s872_s8, %s872_s8, %s873_s13  }
   0xf   :  { %s875_s20 = smov [#allocation3]   ;;  %s876_s22 = smov [#allocation8]  }
  0x10   :  { %s32_s21 = sshll.u32 %s875_s20, 4  ;;  %s62_s0 = sshll.u32 %s876_s22, 4  ;;  %s33_s21 = int_to_ptr.vmem [resolvable:$true] %s32_s21  ;;  %s63_s0 = int_to_ptr.vmem [resolvable:$true] %s62_s0 }
  0x11   :  { %38 = dma.hbm_to_vmem [thread:$0]  %s31_s1, 512, %s33_s21, [#allocation4], %s872_s8, %s872_s8, %s873_s13  }
  0x12   :  { %s877_s23 = smov 32   ;;  %s878_s24 = smov 2  }
  0x13   :  { %68 = dma.hbm_to_vmem [thread:$0]  %s61_s19, 224, %s63_s0, [#allocation7], %s877_s23, %s877_s23, %s878_s24  }
  0x14   :  { %s92_s4 = sshll.u32 %s1166_s9, 4  ;;  %s879_s27 = smov [#allocation11]   ;;  %s93_s4 = int_to_ptr.hbm [resolvable:$true] %s92_s4 }
  0x15   :  { %s94_s28 = sshll.u32 %s879_s27, 4  ;;  %s105_s14 = sshll.u32 %s1167_s10, 4  ;;  %s95_s28 = int_to_ptr.vmem [resolvable:$true] %s94_s28  ;;  %s106_s14 = int_to_ptr.hbm [resolvable:$true] %s105_s14 }
  0x16   :  { %100 = dma.hbm_to_vmem [thread:$0]  %s93_s4, 512, %s95_s28, [#allocation10], %s872_s8, %s872_s8, %s873_s13  }
  0x17   :  { %s880_s15 = smov [#allocation12]  }
  0x18   :  { %s107_s16 = sshll.u32 %s880_s15, 4  ;;  %s108_s16 = int_to_ptr.vmem [resolvable:$true] %s107_s16 }
  0x19   :  { %113 = dma.hbm_to_vmem [thread:$0]  %s106_s14, 512, %s108_s16, [#allocation13], %s872_s8, %s872_s8, %s873_s13  }
  0x1a   :  { %847 = dma.done.wait [#allocation4], 512  }
  0x1b   :  { %848 = vsyncadd [#allocation4], 4294966784 }
  0x1c   :  { %849 = dma.done.wait [#allocation7], 736  }
  0x1d   :  { %850 = vsyncadd [#allocation7], 4294966560 }
  0x1e   :  { %851 = dma.done.wait [#allocation10], 1024  }
  0x1f   :  { %852 = vsyncadd [#allocation10], 4294966272 }
  0x20   :  { %853 = dma.done.wait [#allocation13], 512  }
  0x21   :  { %854 = vsyncadd [#allocation13], 4294966784  ;;  %v991_v1 = vld [vmem:[#allocation3] sm:$0xff]  ;;  %v993_v2 = vld [vmem:[#allocation3 + $0x8] sm:$0xff]  ;;  %s1053_s5 = smov 0  }
  0x22   :  { %v995_v3 = vld [vmem:[#allocation3 + $0x10] sm:$0xff]  ;;  %v997_v4 = vld [vmem:[#allocation3 + $0x18] sm:$0xff]  ;;  %v999_v5 = vld [vmem:[#allocation6] sm:$0xff] }
  0x23   :  { %v1001_v6 = vld [vmem:[#allocation6 + $0x8] sm:$0xff]  ;;  %v1003_v7 = vld [vmem:[#allocation6 + $0x10] sm:$0xff]  ;;  %v1005_v8 = vld [vmem:[#allocation6 + $0x18] sm:$0xff] }
  0x24   :  { %v1007_v9 = vld [vmem:[#allocation9] sm:$0xff]  ;;  %v1009_v10 = vld [vmem:[#allocation9 + $0x8] sm:$0xff]  ;;  %v1011_v11 = vld [vmem:[#allocation9 + $0x10] sm:$0xff] }
  0x25   :  { %v1013_v12 = vld [vmem:[#allocation9 + $0x18] sm:$0xff]  ;;  %v1018_v13 = vld [vmem:[%s1163_s6] sm:$0x1]  ;;  %v1027_v16 = vld [vmem:[#allocation11] sm:$0xff] }
  0x26   :  { %v1023_v14 = vld [vmem:[%s1164_s7] sm:$0x1]  ;;  %v1029_v17 = vld [vmem:[#allocation11 + $0x8] sm:$0xff]  ;;  %v1033_v19 = vld [vmem:[#allocation11 + $0x18] sm:$0xff] }
  0x27   :  { %v1025_v15 = vld [vmem:[#allocation2] sm:$0x1]  ;;  %v1035_v20 = vld [vmem:[#allocation12] sm:$0xff]  ;;  %v1037_v21 = vld [vmem:[#allocation12 + $0x8] sm:$0xff] }
  0x28   :  { %v1031_v18 = vld [vmem:[#allocation11 + $0x10] sm:$0xff]  ;;  %v1041_v23 = vld [vmem:[#allocation12 + $0x18] sm:$0xff] }
  0x29   :  { %v1039_v22 = vld [vmem:[#allocation12 + $0x10] sm:$0xff] }
  0x2a   :  { %v161_v24 = vld [vmem:[%s1159_s2] sm:$0x3]  }
  0x2b   :  { %v162_v25 = vld [vmem:[%s1160_s3] sm:$0x3]  }
  0x2c LB: > { %190 = vmatpush.msra.mxu0 %v1013_v12  ;;  %404 = vmatpush.msra.mxu2 %v997_v4  ;;  %vm174_vm0 = vcmask 261120   ;;  %v232_v26 = vperm.slane %v1025_v15, 0  ;;  %v881_v27 = vmov 0   ;;  %v172_v28 = vperm.slane %v1018_v13, 0  ;;  %s1120_s2 = sshll.u32 %s869_s5, 1  ;;  %s882_s18 = smov 32   ;;  %s869_s5 = sphi %s1053_s5, %s168_s5   ;;  %v865_v24 = vphi %v161_v24, %v503_v24   ;;  %v861_v25 = vphi %v162_v25, %v514_v25  }
  0x2d   : > { %371 = vmatpush.msra.mxu1 %v993_v2  ;;  %422 = vmatpush.msra.mxu3 %v1041_v23  ;;  %v213_v35 = vperm.slane %v1023_v14, 0  ;;  %v245_v52 = vlaneseq  ;;  %vm250_vm1 = vcmask 130112   ;;  %vm255_vm2 = vcmask 1041409   ;;  %s510_s3 = scalar_lea.vmem [#allocation15], %s1120_s2  ;;  %s457_s19 = scalar_lea.vmem [#allocation8], %s1120_s2 }
  0x2e   : > { %191 = vmatpush.msra.mxu0 %v1011_v11  ;;  %405 = vmatpush.msra.mxu2 %v995_v3  ;;  %vm258_vm3 = vcmask 123904   ;;  %vm354_vm12 = vcmask 130048   ;;  %s883_s20 = smov 64   ;;  %s884_s21 = smov 96  }
  0x2f   : > { %372 = vmatpush.msra.mxu1 %v991_v1  ;;  %423 = vmatpush.msra.mxu3 %v1039_v22  ;;  %v1091_v54 = vand.u32 127, %v245_v52  ;;  %s505_s22 = scalar_lea.vmem [#allocation14], %s1120_s2  ;;  %s168_s5 = sadd.s32 1, %s869_s5  }
  0x30   : > { %192 = vmatpush.msra.mxu0 %v1009_v10  ;;  %620 = vset.pattern.permute.xlu2 %v881_v27  ;;  %p165_p0 = scmp.ge.s32.totalorder %s168_s5, 7  }
  0x31   : > { %448 = vmatpush.msrb.mxu1 %v1033_v19  ;;  %424 = vmatpush.msra.mxu3 %v1037_v21  ;;  %v1094_v56 = vadd.s32 4294967288, %v1091_v54  ;;  %s522_s26 = sshll.u32 (%p165_p0), %s1168_s11, 4  ;;  %s885_s4 = smov (%p165_p0), [#allocation14]   ;;  %s523_s26 = int_to_ptr.hbm [resolvable:$true] %s522_s26 }
  0x32   : > { %193 = vmatpush.msra.mxu0 %v1007_v9  ;;  %622 = vset.pattern.permute.xlu1 %v881_v27  ;;  %s520_s27 = sshll.u32 (%p165_p0), %s885_s4, 4  ;;  %s886_s28 = smov (%p165_p0), [#allocation15]   ;;  %s521_s27 = int_to_ptr.vmem [resolvable:$true] %s520_s27 }
  0x33   : > { %449 = vmatpush.msrb.mxu1 %v1031_v18  ;;  %573 = vmatmul.msk.f32.vlgmr.msra.gmra.mxu0 %vm174_vm0, %v865_v24  ;;  %s533_s29 = sshll.u32 (%p165_p0), %s886_s28, 4  ;;  %s535_s15 = sshll.u32 (%p165_p0), %s1169_s12, 4  ;;  %s534_s29 = int_to_ptr.vmem [resolvable:$true] %s533_s29  ;;  %s536_s15 = int_to_ptr.hbm [resolvable:$true] %s535_s15 }
  0x34   : > { %425 = vmatpush.msra.mxu3 %v1035_v20  ;;  %234 = vperm.xlu2 %620, %v232_v26  }
  0x35   : > { %576 = vmatmul.msk.f32.vlgmr.msra.gmra.mxu3 %vm174_vm0, %v865_v24  ;;  %450 = vmatpush.msrb.mxu1 %v1029_v17 }
  0x36   : > { %621 = vset.pattern.permute.xlu0 %v881_v27 }
  0x37   : > { %451 = vmatpush.msrb.mxu1 %v1027_v16 }
  0x8e   : > { %v235_v55 = vpop.permute.xlu2 %234 }
  0xb0   : > { %v195_v29 = vpop.f32.mrf.mxu0 }
  0xb1   : > { %v196_v30 = vadd.f32 %v195_v29, %v172_v28 }
  0xb3   : > { %v199_v31 = vrot.slane %v196_v30, 1  ;;  %v200_v32 = vperm.slane %v196_v30, 0 }
  0xb5   : > { %v201_v33 = vperm.slane %v199_v31, 0  ;;  %v204_v34 = vadd.f32 %v200_v32, %v999_v5  ;;  %v205_v36 = vadd.f32 %v200_v32, %v1001_v6 }
  0xb7   : > { %v208_v37 = vmax.f32 %v204_v34, 0.0  ;;  %v206_v38 = vadd.f32 %v201_v33, %v1003_v7  ;;  %v207_v41 = vadd.f32 %v201_v33, %v1005_v8  ;;  %v209_v44 = vmax.f32 %v205_v36, 0.0 }
  0xb9   : > { %v215_v39 = vmul.f32 %v213_v35, %v208_v37  ;;  %v210_v40 = vmax.f32 %v206_v38, 0.0  ;;  %v211_v46 = vmax.f32 %v207_v41, 0.0  ;;  %v216_v47 = vmul.f32 %v213_v35, %v209_v44 }
  0xbb   : > { %v219_v42 = vsel %vm174_vm0, %v215_v39, 0.0  ;;  %v217_v43 = vmul.f32 %v213_v35, %v210_v40  ;;  %v218_v48 = vmul.f32 %v213_v35, %v211_v46  ;;  %v222_v49 = vsel %vm174_vm0, %v216_v47, 0.0 }
  0xbc   : > { %220 = vadd.xlane.f32.xlu0 %v219_v42 }
  0xbd   : > { %v225_v45 = vsel %vm174_vm0, %v217_v43, 0.0  ;;  %v228_v50 = vsel %vm174_vm0, %v218_v48, 0.0 }
  0xbe   : > { %226 = vadd.xlane.f32.xlu1 %v225_v45 }
  0xc4   : > { %223 = vadd.xlane.f32.xlu0 %v222_v49 }
  0xc6   : > { %229 = vadd.xlane.f32.xlu1 %v228_v50 }
 0x12f   : > { %v221_v51 = vpop.xlane.xlu0 %220 }
 0x130   : > { %v237_v58 = vadd.f32 %v235_v55, %v221_v51 }
 0x131   : > { %v227_v53 = vpop.xlane.xlu1 %226 }
 0x132   : > { %v239_v59 = vadd.f32 %v235_v55, %v227_v53  ;;  %v247_v0 = vperm.slane %v237_v58, %v1091_v54 }
 0x134   : > { %v252_v24 = vperm.slane %v239_v59, %v1091_v54 }
 0x137   : > { %v224_v57 = vpop.xlane.xlu0 %223 }
 0x138   : > { %v238_v60 = vadd.f32 %v235_v55, %v224_v57 }
 0x139   : > { %v230_v61 = vpop.xlane.xlu1 %229 }
 0x13a   : > { %v249_v62 = vperm.slane %v238_v60, %v1094_v56  ;;  %v240_v63 = vadd.f32 %v235_v55, %v230_v61 }
 0x13c   : > { %v253_v26 = vperm.slane %v240_v63, %v1094_v56  ;;  %v251_v27 = vsel %vm250_vm1, %v249_v62, %v247_v0 }
 0x13e   : > { %v254_v28 = vsel %vm250_vm1, %v253_v26, %v252_v24 }
 0x13f   : > { %v256_v29 = vsel %vm255_vm2, %v254_v28, %v251_v27 }
 0x140   : > { %v259_v30 = vsel %vm258_vm3, %v256_v29, -inf }
 0x141   : > { %260 = vmax.xlane.f32.xlu2 %v259_v30 }
 0x1b4   : > { %v261_v31 = vpop.xlane.xlu2 %260 }
 0x1b5   : > { %v263_v32 = vperm.slane %v261_v31, 0  ;;  %v264_v35 = vperm.slane %v261_v31, 1 }
 0x1b7   : > { %v267_v33 = vsub.f32 %v237_v58, %v263_v32  ;;  %v268_v34 = vsub.f32 %v238_v60, %v263_v32  ;;  %v269_v38 = vsub.f32 %v239_v59, %v264_v35  ;;  %v270_v42 = vsub.f32 %v240_v63, %v264_v35 }
 0x1b9   : > { %v271_v36 = vmul.f32 1.442695, %v267_v33  ;;  %v273_v37 = vmul.f32 1.442695, %v268_v34  ;;  %v275_v39 = vmul.f32 1.442695, %v269_v38 }
 0x1ba   : > { %v277_v43 = vmul.f32 1.442695, %v270_v42 }
 0x1bb   : > { %623 = vpow2.f32 %v271_v36 }
 0x1bc   : > { %625 = vpow2.f32 %v273_v37 }
 0x1bd   : > { %627 = vpow2.f32 %v275_v39 }
 0x1be   : > { %629 = vpow2.f32 %v277_v43 }
 0x1c1   : > { %v624_v40 = vpop.eup %623 }
 0x1c2   : > { %v1104_v41 = vpop.eup %625  ;;  %284 = vperm.xlu0 %621, %v624_v40  }
 0x1c3   : > { %287 = vperm.xlu1 %622, %v1104_v41   ;;  %v628_v44 = vpop.eup %627 }
 0x1c4   : > { %v630_v45 = vpop.eup %629 }
 0x1cb   : > { %290 = vperm.xlu1 %622, %v628_v44  }
 0x1d3   : > { %293 = vperm.xlu1 %622, %v630_v45  }
 0x234   : > { %v285_v48 = vpop.permute.xlu0 %284 }
 0x235   : > { %v288_v46 = vpop.permute.xlu1 %287  ;;  %v295_v50 = vperm.slane %v285_v48, %v1091_v54 }
 0x236   : > { %v296_v49 = vperm.slane %v288_v46, %v1094_v56 }
 0x238   : > { %v297_v55 = vsel %vm250_vm1, %v296_v49, %v295_v50 }
 0x23d   : > { %v291_v47 = vpop.permute.xlu1 %290 }
 0x23e   : > { %v298_v52 = vperm.slane %v291_v47, %v1091_v54 }
 0x245   : > { %v294_v51 = vpop.permute.xlu1 %293 }
 0x246   : > { %v299_v53 = vperm.slane %v294_v51, %v1094_v56 }
 0x248   : > { %v300_v57 = vsel %vm250_vm1, %v299_v53, %v298_v52 }
 0x249   : > { %v301_v58 = vsel %vm255_vm2, %v300_v57, %v297_v55 }
 0x24a   : > { %v303_v59 = vsel %vm258_vm3, %v301_v58, 0.0 }
 0x24b   : > { %304 = vadd.xlane.f32.xlu2 %v303_v59 }
 0x2be   : > { %v305_v60 = vpop.xlane.xlu2 %304 }
 0x2bf   : > { %v307_v61 = vperm.slane %v305_v60, 0  ;;  %v308_v62 = vperm.slane %v305_v60, 1 }
 0x2c1   : > { %631 = vrcp.f32 %v307_v61  ;;  %v322_v29 = vand.u32 2147483648, %v307_v61  ;;  %v338_v30 = vand.u32 2147483648, %v308_v62  ;;  %v320_v32 = vand.u32 2147483647, %v307_v61 }
 0x2c2   : > { %633 = vrcp.f32 %v308_v62  ;;  %v336_v34 = vand.u32 2147483647, %v308_v62  ;;  %vm316_vm6 = vweird.f32 %v307_v61  ;;  %vm332_vm7 = vweird.f32 %v308_v62 }
 0x2c3   : > { %v323_v37 = vor.u32 1.1754944e-38, %v322_v29  ;;  %v339_v38 = vor.u32 1.1754944e-38, %v338_v30  ;;  %vm321_vm10 = vcmp.eq.f32.partialorder %v320_v32, 8.507059e+37 }
 0x2c4   : > { %vm337_vm11 = vcmp.eq.f32.partialorder %v336_v34, 8.507059e+37 }
 0x2c7   : > { %v632_v63 = vpop.eup %631 }
 0x2c8   : > { %v634_v0 = vpop.eup %633  ;;  %v312_v24 = vmul.f32 %v632_v63, %v307_v61  ;;  %vm317_vm4 = vweird.f32 %v632_v63 }
 0x2c9   : > { %v328_v26 = vmul.f32 %v634_v0, %v308_v62  ;;  %vm333_vm5 = vweird.f32 %v634_v0  ;;  %vm318_vm8 = vmor %vm316_vm6, %vm317_vm4 }
 0x2ca   : > { %v313_v27 = vsub.f32 1.0, %v312_v24  ;;  %vm334_vm9 = vmor %vm332_vm7, %vm333_vm5 }
 0x2cb   : > { %v329_v28 = vsub.f32 1.0, %v328_v26 }
 0x2cc   : > { %v314_v31 = vmul.f32 %v632_v63, %v313_v27 }
 0x2cd   : > { %v330_v33 = vmul.f32 %v634_v0, %v329_v28 }
 0x2ce   : > { %v315_v35 = vadd.f32 %v632_v63, %v314_v31 }
 0x2cf   : > { %v331_v36 = vadd.f32 %v634_v0, %v330_v33 }
 0x2d0   : > { %v319_v39 = vsel %vm318_vm8, %v632_v63, %v315_v35 }
 0x2d1   : > { %v335_v42 = vsel %vm334_vm9, %v634_v0, %v331_v36  ;;  %v324_v43 = vsel %vm321_vm10, %v323_v37, %v319_v39  ;;  %v458_v0 = vld [vmem:[%s457_s19] sm:$0x3] }
 0x2d2   : > { %v340_v46 = vsel %vm337_vm11, %v339_v38, %v335_v42  ;;  %v325_v47 = vmul.f32 %v624_v40, %v324_v43  ;;  %v326_v50 = vmul.f32 %v1104_v41, %v324_v43 }
 0x2d3   : > { %v342_v48 = vmul.f32 %v630_v45, %v340_v46  ;;  %v341_v49 = vmul.f32 %v628_v44, %v340_v46 }
 0x2d4   : > { %346 = vperm.xlu2 %620, %v325_v47  }
 0x2d5   : > { %383 = vperm.xlu1 %622, %v342_v48   ;;  %380 = vperm.xlu0 %621, %v341_v49  }
 0x2dd   : > { %349 = vperm.xlu0 %621, %v326_v50  }
 0x2e5   : > { %481 = vrot.lane.b32.xlu0 %v861_v25, %s882_s18 }
 0x32e   : > { %v347_v40 = vpop.permute.xlu2 %346 }
 0x32f   : > { %v351_v45 = vperm.slane %v347_v40, %v1091_v54 }
 0x347   : > { %v384_v51 = vpop.permute.xlu1 %383  ;;  %v381_v52 = vpop.permute.xlu0 %380 }
 0x348   : > { %v386_v53 = vperm.slane %v384_v51, %v1094_v56  ;;  %v385_v55 = vperm.slane %v381_v52, %v1091_v54 }
 0x34a   : > { %v387_v57 = vsel %vm250_vm1, %v386_v53, %v385_v55 }
 0x34b   : > { %575 = vmatmul.msk.f32.vlgmr.msra.gmra.mxu2 %vm354_vm12, %v387_v57 }
 0x34f   : > { %v350_v44 = vpop.permute.xlu0 %349 }
 0x350   : > { %v352_v41 = vperm.slane %v350_v44, %v1094_v56  ;;  %v427_v56 = vpop.f32.mrf.mxu3 }
 0x352   : > { %v353_v58 = vsel %vm250_vm1, %v352_v41, %v351_v45  ;;  %vm506_vm1 = vcmask 254976  }
 0x353   : > { %574 = vmatmul.msk.f32.vlgmr.msra.gmra.mxu1 %vm354_vm12, %v353_v58  ;;  %v508_v59 = vsel %vm255_vm2, %v387_v57, %v353_v58 }
 0x354   : > { %511 = vst.msk [vmem:[%s510_s3] sm:$0x3] %vm258_vm3, %v508_v59 }
 0x355   :  { %541 = dma.vmem_to_hbm [thread:$0]  (%p165_p0), %s534_s29, 224, %s536_s15, [#allocation16], %s877_s23, %s877_s23, %s878_s24  }
 0x357   : > { %v482_v46 = vpop.permute.xlu0 %481 }
 0x3ce   : > { %v407_v60 = vpop.f32.mrf.mxu2 }
 0x3cf   : > { %v432_v61 = vrot.slane %v407_v60, 7 }
 0x3d0   : > { %v374_v62 = vpop.f32.mrf.mxu1 }
 0x3d1   : > { %v433_v54 = vsel %vm255_vm2, %v432_v61, %v374_v62 }
 0x3d2   : > { %577 = vmatmul.msk.f32.vlgmr.msrb.gmra.mxu1 %vm174_vm0, %v433_v54 }
 0x44f   : > { %v453_v63 = vpop.f32.mrf.mxu1 }
 0x450   : > { %v454_v24 = vadd.f32 %v453_v63, %v427_v56 }
 0x452   : > { %v459_v26 = vadd.f32 %v458_v0, %v454_v24 }
 0x454   : > { %635 = vtanh.f32 %v459_v26  ;;  %v579_v28 = vmul.f32 -1.442695, %v459_v26 }
 0x456   : > { %637 = vpow2.f32 %v579_v28 }
 0x45a   : > { %v636_v27 = vpop.eup %635 }
 0x45b   : > { %486 = vrot.lane.b32.xlu1 %v636_v27, %s883_s20 }
 0x45c   : > { %v638_v25 = vpop.eup %637 }
 0x45d   : > { %v463_v29 = vadd.f32 1.0, %v638_v25 }
 0x45f   : > { %639 = vrcp.f32 %v463_v29  ;;  %v475_v35 = vand.u32 2147483648, %v463_v29  ;;  %vm469_vm14 = vweird.f32 %v463_v29  ;;  %v473_v36 = vand.u32 2147483647, %v463_v29 }
 0x461   : > { %v476_v38 = vor.u32 1.1754944e-38, %v475_v35  ;;  %vm474_vm0 = vcmp.eq.f32.partialorder %v473_v36, 8.507059e+37 }
 0x465   : > { %v640_v30 = vpop.eup %639 }
 0x466   : > { %v465_v31 = vmul.f32 %v640_v30, %v463_v29  ;;  %vm470_vm13 = vweird.f32 %v640_v30 }
 0x467   : > { %vm471_vm15 = vmor %vm469_vm14, %vm470_vm13 }
 0x468   : > { %v466_v32 = vsub.f32 1.0, %v465_v31 }
 0x46a   : > { %v467_v33 = vmul.f32 %v640_v30, %v466_v32 }
 0x46c   : > { %v468_v34 = vadd.f32 %v640_v30, %v467_v33 }
 0x46e   : > { %v472_v37 = vsel %vm471_vm15, %v640_v30, %v468_v34 }
 0x46f   : > { %v477_v39 = vsel %vm474_vm0, %v476_v38, %v472_v37 }
 0x470   : > { %v484_v47 = vmul.f32 %v482_v46, %v477_v39 }
 0x4cd   : > { %v487_v42 = vpop.permute.xlu1 %486 }
 0x4ce   : > { %v489_v43 = vmul.f32 %v487_v42, %v477_v39 }
 0x4d0   : > { %491 = vrot.lane.b32.xlu1 %v489_v43, %s882_s18 }
 0x542   : > { %v492_v48 = vpop.permute.xlu1 %491 }
 0x543   : > { %v494_v49 = vadd.f32 %v492_v48, %v484_v47 }
 0x545   : > { %641 = vtanh.f32 %v494_v49  ;;  %513 = vrot.lane.b32.xlu2 %v494_v49, %s884_s21 }
 0x54b   : > { %v642_v50 = vpop.eup %641 }
 0x54c   : > { %497 = vrot.lane.b32.xlu0 %v642_v50, %s883_s20 }
 0x59f   : > { %v514_v25 = vpop.permute.xlu2 %513  }
 0x5be   : > { %v498_v51 = vpop.permute.xlu0 %497 }
 0x5bf   : > { %v500_v52 = vmul.f32 %v498_v51, %v477_v39 }
 0x5c1   : > { %502 = vrot.lane.b32.xlu1 %v500_v52, %s882_s18 }
 0x630   :  { %167 = sbr.rel (!%p165_p0) target bundleno = 44 (0x2c), region = 106 }
 0x633   : > { %v503_v24 = vpop.permute.xlu1 %502  }
 0x634   : > { %507 = vst.msk [vmem:[%s505_s22] sm:$0x3] %vm506_vm1, %v503_v24 }
 0x635   :  { %528 = dma.vmem_to_hbm [thread:$0]  %s521_s27, 224, %s523_s26, [#allocation5], %s877_s23, %s877_s23, %s878_s24  }
 0x636   :  { %855 = dma.done.wait [#allocation5], 224  }
 0x637   :  { %856 = vsyncadd [#allocation5], 4294967072 }
 0x638   :  { %857 = dma.done.wait [#allocation16], 224  }
 0x639   :  { %858 = vsyncadd [#allocation16], 4294967072 }
 0x63a   :  { %550 = vsyncpa [#allocation4], 1 }
 0x63b   :  { %551 = vsyncpa [#allocation7], 1 }
 0x63c   :  { %552 = vsyncpa [#allocation10], 1 }
 0x63d   :  { %553 = vsyncpa [#allocation13], 1 }
 0x63e   :  { %554 = vsyncpa [#allocation5], 1 }
 0x63f   :  { %555 = vsyncpa [#allocation16], 1 }

</bundles_post_ra>
